<compile_context>
chip_gen: v5e
topology: v5e:2x2
jax: 0.10.0
libtpu: 0.0.40
codegen_flags: <defaults>
</compile_context>

<pallas_src>
import functools

import jax
import jax.numpy as jnp
from jax.experimental import pallas as pl
from jax.experimental.pallas import tpu as pltpu


# ----------------------------------------------------------------------------
# generation-aware defaults
# ----------------------------------------------------------------------------
def _tpu_tile_defaults():
    """(tm_target, tn_target, tk_target, vmem_limit_bytes).

    v5e / v6e have 128 MiB physical VMEM -> larger tiles + explicit scoped limit.
    v7x has 64 MiB -> keep the conservative defaults. Falls back safely if the
    hardware query is unavailable."""
    try:
        vmem = int(pltpu.get_tpu_info().vmem_capacity_bytes)
    except Exception:  # defensive: unknown backend / API variation
        vmem = None
    if vmem is not None and vmem >= 100 * 1024 * 1024:      # v5e / v6e
        return 512, 1024, 1024, 64 * 1024 * 1024
    return 256, 512, 512, None                              # v7x / unknown


_TM_T, _TN_T, _TK_T, _VMEM_LIMIT = _tpu_tile_defaults()


def _compiler_params(dims):
    kw = dict(dimension_semantics=dims)
    if _VMEM_LIMIT is not None:
        kw["vmem_limit_bytes"] = _VMEM_LIMIT
    return pltpu.CompilerParams(**kw)


def _fit_tile(dim, target, align):
    """Largest tile <= target that divides `dim` and is a multiple of `align`;
    falls back to the full dim (always a legal block shape).
    NOTE: for awkward large dims the fallback can exceed the scoped VMEM budget;
    all shapes used by this model divide cleanly or are small."""
    if dim <= target:
        return dim
    t = (target // align) * align
    while t >= align:
        if dim % t == 0:
            return t
        t -= align
    return dim


# ----------------------------------------------------------------------------
# Fused linear kernel:
#   y = [ReLU]( LN_relu?(LN?(x)) @ W + b ) [+ residual]
# with x tiles optionally pre-LayerNormed (requires tk == Din), f32 accumulator,
# bias / activation / residual fused into the last-k epilogue.
# ----------------------------------------------------------------------------
def _linear_kernel(x_ref, w_ref, b_ref, *rest,
                   activation, fuse_ln, ln_relu, fuse_res, eps):
    idx = 0
    if fuse_ln:
        g_ref, beta_ref = rest[0], rest[1]
        idx = 2
    if fuse_res:
        res_ref = rest[idx]
        idx += 1
    o_ref, acc_ref = rest[idx], rest[idx + 1]

    @pl.when(pl.program_id(2) == 0)
    def _():
        acc_ref[...] = jnp.zeros_like(acc_ref)

    x = x_ref[...]
    if fuse_ln:
        xf = x.astype(jnp.float32)
        mu = jnp.mean(xf, axis=-1, keepdims=True)
        xc = xf - mu
        var = jnp.mean(xc * xc, axis=-1, keepdims=True)
        xn = xc * jax.lax.rsqrt(var + eps)
        xn = xn * g_ref[...].astype(jnp.float32) + beta_ref[...].astype(jnp.float32)
        if ln_relu:
            xn = jnp.maximum(xn, 0.0)
        x = xn.astype(x_ref.dtype)          # back to the MXU input dtype (bf16)

    # Weight is pre-transposed in the wrapper to (Din, Dout): standard contraction.
    acc_ref[...] += jax.lax.dot_general(
        x, w_ref[...],
        dimension_numbers=(((1,), (0,)), ((), ())),
        preferred_element_type=jnp.float32,
    )

    @pl.when(pl.program_id(2) == pl.num_programs(2) - 1)
    def _():
        y = acc_ref[...] + b_ref[...].astype(jnp.float32)
        if activation == "relu":
            y = jnp.maximum(y, 0.0)
        if fuse_res:
            y = y + res_ref[...].astype(jnp.float32)
        o_ref[...] = y.astype(o_ref.dtype)


def pallas_linear(x2d, w, b, *, activation="none", ln=None, ln_relu=False,
                  residual=None, out_dtype=None, eps=1e-5,
                  tm_target=None, tn_target=None, tk_target=None):
    """x2d: (M, Din) in compute dtype, w: (Dout, Din) PyTorch layout, b: (Dout,).

    ln          : optional (gamma, beta) -> LayerNorm of the x tile fused in (tk==Din).
    ln_relu     : apply ReLU right after the fused LayerNorm (rtdl head path).
    activation  : 'relu' fused into the epilogue (FFN first linear).
    residual    : optional (M, Dout) tensor added in the epilogue (residual branch).
    """
    M, Din = x2d.shape
    Dout = w.shape[0]
    cdt = x2d.dtype
    out_dtype = out_dtype or cdt

    tm = _fit_tile(M, tm_target or _TM_T, 8)
    tn = _fit_tile(Dout, tn_target or _TN_T, 128)
    tk = Din if ln is not None else _fit_tile(Din, tk_target or _TK_T, 128)
    grid = (M // tm, Dout // tn, Din // tk)

    w_t = w.astype(cdt).T                                   # (Din, Dout), MXU-native

    inputs = [x2d, w_t, b.reshape(1, Dout).astype(jnp.float32)]
    in_specs = [
        pl.BlockSpec((tm, tk), lambda i, j, k: (i, k)),
        pl.BlockSpec((tk, tn), lambda i, j, k: (k, j)),
        pl.BlockSpec((1, tn), lambda i, j, k: (0, j)),
    ]
    if ln is not None:
        g, beta = ln
        inputs += [g.reshape(1, Din).astype(jnp.float32),
                   beta.reshape(1, Din).astype(jnp.float32)]
        in_specs += [pl.BlockSpec((1, tk), lambda i, j, k: (0, k)),
                     pl.BlockSpec((1, tk), lambda i, j, k: (0, k))]
    if residual is not None:
        inputs.append(residual)
        in_specs.append(pl.BlockSpec((tm, tn), lambda i, j, k: (i, j)))

    kernel = functools.partial(_linear_kernel, activation=activation,
                               fuse_ln=ln is not None, ln_relu=ln_relu,
                               fuse_res=residual is not None, eps=eps)
    return pl.pallas_call(
        kernel,
        out_shape=jax.ShapeDtypeStruct((M, Dout), out_dtype),
        grid_spec=pltpu.PrefetchScalarGridSpec(
            num_scalar_prefetch=0,
            grid=grid,
            in_specs=in_specs,
            out_specs=pl.BlockSpec((tm, tn), lambda i, j, k: (i, j)),
            scratch_shapes=[pltpu.VMEM((tm, tn), jnp.float32)],
        ),
        compiler_params=_compiler_params(("parallel", "parallel", "arbitrary")),
    )(*inputs)


# ----------------------------------------------------------------------------
# Self-attention on the fused QKV activation: (B, N, 3D) -> ctx (B, N, D)
# All heads of one batch row per grid step; softmax in f32; probability matrix
# cast to the compute dtype for the PV matmul; per-head contexts concatenated
# so the (N, D) output is written with a single lane-dense store.
# ----------------------------------------------------------------------------
def _mha_kernel(qkv_ref, ctx_ref, *, n_heads, d_head, scale):
    qkv = qkv_ref[0]                                   # (N, 3*D), compute dtype
    d_token = n_heads * d_head
    q_all = qkv[:, :d_token]
    k_all = qkv[:, d_token:2 * d_token]
    v_all = qkv[:, 2 * d_token:]

    ctx_parts = []
    for h in range(n_heads):                           # static unroll over heads
        lo = h * d_head
        q = q_all[:, lo:lo + d_head]                   # (N, dh)
        k = k_all[:, lo:lo + d_head]
        v = v_all[:, lo:lo + d_head]
        s = jax.lax.dot_general(
            q, k, dimension_numbers=(((1,), (1,)), ((), ())),
            preferred_element_type=jnp.float32) * scale            # (N, N) f32
        s = s - jnp.max(s, axis=-1, keepdims=True)
        e = jnp.exp(s)
        p = e * pl.reciprocal(jnp.sum(e, axis=-1, keepdims=True), approx=True)
        ctx_parts.append(jax.lax.dot_general(
            p.astype(v.dtype), v,                                   # bf16 PV matmul
            dimension_numbers=(((1,), (0,)), ((), ())),
            preferred_element_type=jnp.float32))                    # (N, dh) f32

    ctx = jnp.concatenate(ctx_parts, axis=-1)          # (N, D): single lane-dense store
    ctx_ref[0] = ctx.astype(ctx_ref.dtype)


def pallas_self_attention(qkv, n_heads):
    B, N, threeD = qkv.shape
    D = threeD // 3
    d_head = D // n_heads
    kernel = functools.partial(_mha_kernel, n_heads=n_heads, d_head=d_head,
                               scale=float(d_head) ** (-0.5))
    return pl.pallas_call(
        kernel,
        out_shape=jax.ShapeDtypeStruct((B, N, D), qkv.dtype),
        grid=(B,),
        in_specs=[pl.BlockSpec((1, N, threeD), lambda b: (b, 0, 0))],
        out_specs=pl.BlockSpec((1, N, D), lambda b: (b, 0, 0)),
        compiler_params=_compiler_params(("parallel",)),
    )(qkv)


# ----------------------------------------------------------------------------
# Parameter init (module-consistent shapes; LayerNorm = ones/zeros, linears ~ kaiming)
# ----------------------------------------------------------------------------
def init_transformer_params(key, *, d_token, n_blocks, n_heads, ffn_d_hidden, d_out):
    del n_heads

    def linear_params(k, d_in, d_o):
        kw, kb = jax.random.split(k)
        wb = (2.0 / d_in) ** 0.5
        bb = 1.0 / d_in ** 0.5
        return {"w": jax.random.uniform(kw, (d_o, d_in), jnp.float32, -wb, wb),
                "b": jax.random.uniform(kb, (d_o,), jnp.float32, -bb, bb)}

    def ln_params(d):
        return {"g": jnp.ones((d,), jnp.float32), "b": jnp.zeros((d,), jnp.float32)}

    blocks = []
    for layer_idx in range(n_blocks):
        key, k1, k2, k3, k4 = jax.random.split(key, 5)
        blk = {
            "qkv": linear_params(k1, d_token, 3 * d_token),   # fused W_q | W_k | W_v
            "out": linear_params(k2, d_token, d_token),       # W_out
            "ffn1": linear_params(k3, d_token, ffn_d_hidden),
            "ffn2": linear_params(k4, ffn_d_hidden, d_token),
            "ffn_norm": ln_params(d_token),
        }
        # prenormalization=True, first_prenormalization=False -> no attn norm on block 0
        if layer_idx > 0:
            blk["attn_norm"] = ln_params(d_token)
        blocks.append(blk)

    key, kh = jax.random.split(key)
    return {"blocks": blocks,
            "head_norm": ln_params(d_token),
            "head": linear_params(kh, d_token, d_out)}


# ----------------------------------------------------------------------------
# Transformer forward: each block is {QKV linear (+fused attn-LN), attention,
# out-proj (+fused residual), FFN1 (+fused ffn-LN, ReLU), FFN2 (+fused residual)};
# head is a single fused (slice -> LN -> ReLU -> linear) call.
# ----------------------------------------------------------------------------
def transformer_forward(params, x, n_heads, compute_dtype=jnp.bfloat16):
    B, N, D = x.shape
    M = B * N
    x2d = x.reshape(M, D).astype(compute_dtype)

    for blk in params["blocks"]:
        attn_ln = blk.get("attn_norm")
        qkv = pallas_linear(
            x2d, blk["qkv"]["w"], blk["qkv"]["b"],
            ln=(attn_ln["g"], attn_ln["b"]) if attn_ln is not None else None)  # (M, 3D)
        ctx = pallas_self_attention(qkv.reshape(B, N, 3 * D), n_heads)          # (B, N, D)
        x2d = pallas_linear(ctx.reshape(M, D), blk["out"]["w"], blk["out"]["b"],
                            residual=x2d)                                       # + residual
        h = pallas_linear(x2d, blk["ffn1"]["w"], blk["ffn1"]["b"],
                          ln=(blk["ffn_norm"]["g"], blk["ffn_norm"]["b"]),
                          activation="relu")
        x2d = pallas_linear(h, blk["ffn2"]["w"], blk["ffn2"]["b"], residual=x2d)

    # ---- head: last token -> LayerNorm -> ReLU -> Linear, single fused kernel ----
    xl = x2d.reshape(B, N, D)[:, -1, :]                                          # (B, D)
    return pallas_linear(xl, params["head"]["w"], params["head"]["b"],
                         ln=(params["head_norm"]["g"], params["head_norm"]["b"]),
                         ln_relu=True, out_dtype=jnp.float32)


# ----------------------------------------------------------------------------
# Pure-JAX reference for verification
# ----------------------------------------------------------------------------
def reference_transformer(params, x, n_heads, eps=1e-5):
    def layernorm(t, g, b):
        mu = t.mean(-1, keepdims=True)
        var = ((t - mu) ** 2).mean(-1, keepdims=True)
        return (t - mu) / jnp.sqrt(var + eps) * g + b

    def linear(t, p):
        return t @ p["w"].T + p["b"]

    B, N, D = x.shape
    d_head = D // n_heads
    for blk in params["blocks"]:
        xr = layernorm(x, blk["attn_norm"]["g"], blk["attn_norm"]["b"]) \
            if "attn_norm" in blk else x
        qkv = linear(xr, blk["qkv"])
        q, k, v = jnp.split(qkv, 3, axis=-1)
        sh = lambda t: t.reshape(B, N, n_heads, d_head).transpose(0, 2, 1, 3)
        qh, kh, vh = sh(q), sh(k), sh(v)
        s = jnp.einsum("bhqd,bhkd->bhqk", qh, kh) * d_head ** (-0.5)
        p = jax.nn.softmax(s, axis=-1)
        ctx = jnp.einsum("bhqk,bhkd->bhqd", p, vh).transpose(0, 2, 1, 3).reshape(B, N, D)
        x = x + linear(ctx, blk["out"])
        xr = layernorm(x, blk["ffn_norm"]["g"], blk["ffn_norm"]["b"])
        x = x + linear(jax.nn.relu(linear(xr, blk["ffn1"])), blk["ffn2"])

    xl = x[:, -1]
    xl = jax.nn.relu(layernorm(xl, params["head_norm"]["g"], params["head_norm"]["b"]))
    return linear(xl, params["head"])


# ----------------------------------------------------------------------------
if __name__ == "__main__":
    # Small shapes consistent with the module: (batch, n_tokens, d_token)
    B, N, D, H = 2, 8, 32, 4
    N_BLOCKS, FFN_HIDDEN, D_OUT = 2, 64, 8

    key = jax.random.PRNGKey(0)
    k_params, k_x = jax.random.split(key)
    params = init_transformer_params(k_params, d_token=D, n_blocks=N_BLOCKS,
                                     n_heads=H, ffn_d_hidden=FFN_HIDDEN, d_out=D_OUT)
    x = jax.random.normal(k_x, (B, N, D), jnp.float32)

    ref = reference_transformer(params, x, H)

    # f32 compute path: tight check that the fused kernels are numerically correct.
    out_f32 = jax.block_until_ready(
        transformer_forward(params, x, H, compute_dtype=jnp.float32))
    assert out_f32.shape == (B, D_OUT)
    err32 = float(jnp.max(jnp.abs(out_f32 - ref)))
    assert jnp.allclose(out_f32, ref, atol=3e-3, rtol=3e-3), f"f32 max_abs_err={err32}"

    # bf16 compute path (default, MXU-native inputs, f32 accumulation): looser tolerance.
    out_bf16 = jax.block_until_ready(transformer_forward(params, x, H))
    out_bf16 = out_bf16.astype(jnp.float32)
    assert out_bf16.shape == (B, D_OUT)
    err16 = float(jnp.max(jnp.abs(out_bf16 - ref)))
    assert jnp.allclose(out_bf16, ref, atol=6e-2, rtol=6e-2), f"bf16 max_abs_err={err16}"

    print("KERNEL_OK")
</pallas_src>

<mosaic_0001>
module attributes {stable_mosaic.version = 11 : i64} {
  func.func @_linear_kernel(%arg0: i32, %arg1: i32, %arg2: i32, %arg3: memref<16x32xf32, #tpu.memory_space<vmem>>, %arg4: memref<32x96xf32, #tpu.memory_space<vmem>>, %arg5: memref<1x96xf32, #tpu.memory_space<vmem>>, %arg6: memref<16x96xf32, #tpu.memory_space<vmem>>, %arg7: memref<16x96xf32, #tpu.memory_space<vmem>>) attributes {dimension_semantics = [#tpu.dimension_semantics<parallel>, #tpu.dimension_semantics<parallel>, #tpu.dimension_semantics<arbitrary>], iteration_bounds = array<i64: 1, 1, 1>, scalar_prefetch = 0 : i64, scratch_operands = 1 : i64, tpu.core_type = #tpu.core_type<tc>, window_params = [{transform_indices = @transform_0, window_bounds = array<i64: 16, 32>}, {transform_indices = @transform_1, window_bounds = array<i64: 32, 96>}, {transform_indices = @transform_2, window_bounds = array<i64: 1, 96>}, {transform_indices = @transform_3, window_bounds = array<i64: 16, 96>}]} {
    %c0_i32 = arith.constant 0 : i32
    %0 = arith.cmpi eq, %arg2, %c0_i32 : i32
    %1 = arith.extui %0 : i1 to i32
    %c0_i32_0 = arith.constant 0 : i32
    %2 = arith.cmpi ne, %1, %c0_i32_0 : i32
    scf.if %2 {
      %cst_10 = arith.constant 0.000000e+00 : f32
      %12 = vector.broadcast %cst_10 : f32 to vector<16x96xf32>
      %c0_11 = arith.constant 0 : index
      %c0_12 = arith.constant 0 : index
      %13 = vector.load %arg7[%c0_11, %c0_12] : memref<16x96xf32, #tpu.memory_space<vmem>>, vector<16x96xf32>
      tpu.vector_store %arg7[%c0_11, %c0_12], %12 {strides = array<i32>} : memref<16x96xf32, #tpu.memory_space<vmem>>, vector<16x96xf32>,
    } else {
    }
    %c0 = arith.constant 0 : index
    %c0_1 = arith.constant 0 : index
    %3 = vector.load %arg3[%c0, %c0_1] : memref<16x32xf32, #tpu.memory_space<vmem>>, vector<16x32xf32>
    %c0_2 = arith.constant 0 : index
    %c0_3 = arith.constant 0 : index
    %4 = vector.load %arg7[%c0_2, %c0_3] : memref<16x96xf32, #tpu.memory_space<vmem>>, vector<16x96xf32>
    %c0_4 = arith.constant 0 : index
    %c0_5 = arith.constant 0 : index
    %5 = vector.load %arg4[%c0_4, %c0_5] : memref<32x96xf32, #tpu.memory_space<vmem>>, vector<32x96xf32>
    %cst = arith.constant dense<0.000000e+00> : vector<16x96xf32>
    %6 = tpu.matmul %3, %5, %cst {dimension_numbers = #tpu.dot_dimension_numbers<[1], [0], [0], [1], [0, 0, 1, 1], [], []>} : vector<16x32xf32>, vector<32x96xf32>, vector<16x96xf32> -> vector<16x96xf32>
    %7 = arith.addf %4, %6 : vector<16x96xf32>
    %c0_6 = arith.constant 0 : index
    %c0_7 = arith.constant 0 : index
    %8 = vector.load %arg7[%c0_6, %c0_7] : memref<16x96xf32, #tpu.memory_space<vmem>>, vector<16x96xf32>
    tpu.vector_store %arg7[%c0_6, %c0_7], %7 {strides = array<i32>} : memref<16x96xf32, #tpu.memory_space<vmem>>, vector<16x96xf32>,
    %c0_i32_8 = arith.constant 0 : i32
    %9 = arith.cmpi eq, %arg2, %c0_i32_8 : i32
    %10 = arith.extui %9 : i1 to i32
    %c0_i32_9 = arith.constant 0 : i32
    %11 = arith.cmpi ne, %10, %c0_i32_9 : i32
    scf.if %11 {
      %c0_10 = arith.constant 0 : index
      %c0_11 = arith.constant 0 : index
      %12 = vector.load %arg7[%c0_10, %c0_11] : memref<16x96xf32, #tpu.memory_space<vmem>>, vector<16x96xf32>
      %c0_12 = arith.constant 0 : index
      %c0_13 = arith.constant 0 : index
      %13 = vector.load %arg5[%c0_12, %c0_13] : memref<1x96xf32, #tpu.memory_space<vmem>>, vector<1x96xf32>
      %14 = vector.broadcast %13 : vector<1x96xf32> to vector<16x96xf32>
      %15 = arith.addf %12, %14 : vector<16x96xf32>
      %c0_14 = arith.constant 0 : index
      %c0_15 = arith.constant 0 : index
      %16 = vector.load %arg6[%c0_14, %c0_15] : memref<16x96xf32, #tpu.memory_space<vmem>>, vector<16x96xf32>
      tpu.vector_store %arg6[%c0_14, %c0_15], %15 {strides = array<i32>} : memref<16x96xf32, #tpu.memory_space<vmem>>, vector<16x96xf32>,
    } else {
    }
    return
  }
  func.func @transform_0(%arg0: i32, %arg1: i32, %arg2: i32) -> (i32, i32) {
    %c0_i32 = arith.constant 0 : i32
    return %arg0, %arg2 : i32, i32
  }
  func.func @transform_1(%arg0: i32, %arg1: i32, %arg2: i32) -> (i32, i32) {
    %c0_i32 = arith.constant 0 : i32
    return %arg2, %arg1 : i32, i32
  }
  func.func @transform_2(%arg0: i32, %arg1: i32, %arg2: i32) -> (i32, i32) {
    %c0_i32 = arith.constant 0 : i32
    %c0_i32_0 = arith.constant 0 : i32
    return %c0_i32, %arg1 : i32, i32
  }
  func.func @transform_3(%arg0: i32, %arg1: i32, %arg2: i32) -> (i32, i32) {
    %c0_i32 = arith.constant 0 : i32
    return %arg0, %arg1 : i32, i32
  }
}

</mosaic_0001>

<bundles_post_ra>
// kernel: tpu_custom_call.1
= control target key start
LH: loop header
LB: loop body
LE: loop exit
PB: predicated region body
PF: predicated region fallthrough
CT: control target
= control target key end

     0   :  { %8 = vsyncpa [#allocation4], 0  ;;  %s274_s0 = inlined_call_operand.hbm [shape: f32[16,32], index: 0, kind: input, shape index: {}]   ;;  %s275_s1 = inlined_call_operand.hbm [shape: f32[32,96], index: 1, kind: input, shape index: {}]   ;;  %s276_s2 = inlined_call_operand.vmem [shape: f32[1,96], index: 2, kind: input, shape index: {}]   ;;  %s277_s3 = inlined_call_operand.hbm [shape: f32[16,96], index: 3, kind: output, shape index: {}]  }
   0x1   :  { %9 = vsyncpa [#allocation7], 0 }
   0x2   :  { %10 = vsyncpa [#allocation5], 0  ;;  %s15_s14 = sshll.u32 %s274_s0, 4  ;;  %s221_s15 = smov [#allocation3]   ;;  %s16_s14 = int_to_ptr.hbm [resolvable:$true] %s15_s14 }
   0x3   :  { %s17_s16 = sshll.u32 %s221_s15, 4  ;;  %s28_s19 = sshll.u32 %s275_s1, 4  ;;  %s18_s16 = int_to_ptr.vmem [resolvable:$true] %s17_s16  ;;  %s29_s19 = int_to_ptr.hbm [resolvable:$true] %s28_s19 }
   0x4   :  { %s222_s20 = smov 128   ;;  %s223_s21 = smov 8  }
   0x5   :  { %23 = dma.hbm_to_vmem [thread:$0]  %s16_s14, 256, %s18_s16, [#allocation4], %s222_s20, %s222_s20, %s223_s21  }
   0x6   :  { %s224_s22 = smov [#allocation6]  }
   0x7   :  { %s30_s23 = sshll.u32 %s224_s22, 4  ;;  %s31_s23 = int_to_ptr.vmem [resolvable:$true] %s30_s23 }
   0x8   :  { %36 = dma.hbm_to_vmem [thread:$0]  %s29_s19, 512, %s31_s23, [#allocation7], %s222_s20, %s222_s20, %s223_s21  }
   0x9   :  { %215 = dma.done.wait [#allocation4], 256  }
   0xa   :  { %216 = vsyncadd [#allocation4], 4294967040 }
   0xb   :  { %217 = dma.done.wait [#allocation7], 512  }
   0xc   :  { %218 = vsyncadd [#allocation7], 4294966784  ;;  %vm51_vm0 = vcmask 785408   ;;  %v225_v0 = vmov 0.0   ;;  %v61_v1 = vld [vmem:[#allocation6 + $0x18] sm:$0xff]  ;;  %v60_v2 = vld [vmem:[#allocation6 + $0x10] sm:$0xff] }
   0xd   :  { %52 = vst.msk [vmem:[#allocation2] sm:$0xff] %vm51_vm0, %v225_v0  ;;  %81 = vmatpush.msra.mxu0 %v61_v1  ;;  %132 = vmatpush.msra.mxu1 %v61_v1  ;;  %v59_v3 = vld [vmem:[#allocation6 + $0x8] sm:$0xff]  ;;  %v58_v4 = vld [vmem:[#allocation6] sm:$0xff]  ;;  %v54_v5 = vld [vmem:[#allocation3] sm:$0xff]  ;;  %vm62_vm1 = vcmask 261120   ;;  %s226_s24 = smov [#allocation8]  }
   0xe   :  { %53 = vst.msk [vmem:[#allocation2 + $0x8] sm:$0xff] %vm51_vm0, %v225_v0  ;;  %v55_v6 = vld [vmem:[#allocation3 + $0x8] sm:$0xff]  ;;  %v142_v13 = vld [vmem:[%s276_s2] ss:$0 sm:$0xff]  ;;  %s114_s25 = sshll.u32 %s226_s24, 4  ;;  %s116_s28 = sshll.u32 %s277_s3, 4  ;;  %s115_s25 = int_to_ptr.vmem [resolvable:$true] %s114_s25  ;;  %s117_s28 = int_to_ptr.hbm [resolvable:$true] %s116_s28 }
   0xf   :  { %82 = vmatpush.msra.mxu0 %v60_v2  ;;  %133 = vmatpush.msra.mxu1 %v60_v2 }
  0x11   :  { %83 = vmatpush.msra.mxu0 %v59_v3  ;;  %134 = vmatpush.msra.mxu1 %v59_v3 }
  0x13   :  { %84 = vmatpush.msra.mxu0 %v58_v4  ;;  %135 = vmatpush.msra.mxu1 %v58_v4 }
  0x14   :  { %130 = vmatmul.msk.f32.vlgmr.msra.gmra.mxu0 %vm62_vm1, %v54_v5  ;;  %131 = vmatmul.msk.f32.vlgmr.msra.gmra.mxu1 %vm62_vm1, %v55_v6  ;;  %v56_v7 = vld [vmem:[#allocation2] sm:$0xff] }
  0x15   :  { %v57_v8 = vld [vmem:[#allocation2 + $0x8] sm:$0xff] }
  0x91   :  { %v86_v9 = vpop.f32.mrf.mxu0  ;;  %v89_v10 = vpop.f32.mrf.mxu1 }
  0x92   :  { %v92_v11 = vadd.f32 %v86_v9, %v56_v7  ;;  %v93_v12 = vadd.f32 %v89_v10, %v57_v8 }
  0x94   :  { %95 = vst.msk [vmem:[#allocation2] sm:$0xff] %vm51_vm0, %v92_v11 }
  0x95   :  { %96 = vst.msk [vmem:[#allocation2 + $0x8] sm:$0xff] %vm51_vm0, %v93_v12 }
  0x9b   :  { %v100_v14 = vld [vmem:[#allocation2] sm:$0xff] }
  0x9c   :  { %v101_v15 = vld [vmem:[#allocation2 + $0x8] sm:$0xff]  ;;  %v106_v16 = vadd.f32 %v142_v13, %v100_v14 }
  0x9d   :  { %v107_v17 = vadd.f32 %v142_v13, %v101_v15 }
  0x9e   :  { %108 = vst.msk [vmem:[#allocation8] sm:$0xff] %vm51_vm0, %v106_v16 }
  0x9f   :  { %109 = vst.msk [vmem:[#allocation8 + $0x8] sm:$0xff] %vm51_vm0, %v107_v17 }
  0xa0   :  { %122 = dma.vmem_to_hbm [thread:$0]  %s115_s25, 256, %s117_s28, [#allocation5], %s222_s20, %s222_s20, %s223_s21  }
  0xa1   :  { %219 = dma.done.wait [#allocation5], 256  }
  0xa2   :  { %220 = vsyncadd [#allocation5], 4294967040 }
  0xa3   :  { %127 = vsyncpa [#allocation4], 1 }
  0xa4   :  { %128 = vsyncpa [#allocation7], 1 }
  0xa5   :  { %129 = vsyncpa [#allocation5], 1 }

</bundles_post_ra>
